<compile_context>
chip_gen: v7x
topology: tpu7x:2x2x1
jax: 0.10.0
libtpu: 0.0.40
codegen_flags: <defaults>
</compile_context>

<pallas_src>
import functools

import jax
import jax.numpy as jnp
from jax.experimental import pallas as pl
from jax.experimental.pallas import tpu as pltpu


# Tile caps: double-buffered A/B/out blocks + (tm, tn) f32 scratch stay at a
# few MiB -- comfortably inside v7x's 64 MiB VMEM and v5e/v6e's 128 MiB.
_TM = 512           # M tile (output rows)
_TN = 256           # N tile (output channels) -- matches 256-wide MXU
_TK = 2048          # max K tile; convs with K <= this get a single full-K step
_VMEM_LIMIT = 48 * 1024 * 1024


def _round_up(x, m):
    return ((x + m - 1) // m) * m


def _tile(dim, max_tile, align):
    """Balanced tiling: minimal padding with tile <= max_tile, tile % align == 0."""
    steps = max(1, -(-dim // max_tile))
    t = _round_up(-(-dim // steps), align)
    return t, t * steps


def _tile_k(K):
    """K tiling that avoids padding whenever possible.

    - K <= _TK and sublane-aligned: one full-K step, no padding at all
      (full-dim blocks are exempt from the 128-lane divisibility rule).
    - otherwise: multiple 128-aligned steps with minimal padding
      (e.g. 2304 -> 2 x 1152, 4608 -> 3 x 1536: zero padding).
    """
    if K <= _TK and K % 8 == 0:
        return K, K
    return _tile(K, _TK, 128)


# ----------------------------------------------------------------------------
# Pallas kernels
# ----------------------------------------------------------------------------
def _mm_bn_kernel(a_ref, b_ref, scale_ref, shift_ref, o_ref, acc_ref, *, relu):
    """out = act((A @ B) * scale + shift); grid = (M tiles, N tiles, K tiles)."""
    k = pl.program_id(2)

    @pl.when(k == 0)
    def _():
        acc_ref[...] = jnp.zeros_like(acc_ref)

    acc_ref[...] += jnp.dot(a_ref[...], b_ref[...],
                            preferred_element_type=jnp.float32)

    @pl.when(k == pl.num_programs(2) - 1)
    def _():
        y = acc_ref[...] * scale_ref[...] + shift_ref[...]
        if relu:
            y = jnp.maximum(y, 0.0)
        o_ref[...] = y.astype(o_ref.dtype)


def _mm_bn_add_relu_kernel(a_ref, b_ref, scale_ref, shift_ref, res_ref,
                           o_ref, acc_ref):
    """out = relu((A @ B) * scale + shift + residual) (bottleneck tail)."""
    k = pl.program_id(2)

    @pl.when(k == 0)
    def _():
        acc_ref[...] = jnp.zeros_like(acc_ref)

    acc_ref[...] += jnp.dot(a_ref[...], b_ref[...],
                            preferred_element_type=jnp.float32)

    @pl.when(k == pl.num_programs(2) - 1)
    def _():
        y = (acc_ref[...] * scale_ref[...] + shift_ref[...]
             + res_ref[...].astype(jnp.float32))
        o_ref[...] = jnp.maximum(y, 0.0).astype(o_ref.dtype)


def _maxpool9_kernel(p_ref, o_ref):
    """p_ref: (9, tm, C) window taps -> elementwise max over the 9 taps."""
    r = p_ref[0]
    for t in range(1, 9):
        r = jnp.maximum(r, p_ref[t])
    o_ref[...] = r


# ----------------------------------------------------------------------------
# Pallas wrappers
# ----------------------------------------------------------------------------
def matmul_bn(a, prep, *, relu, residual=None):
    """a: (M, K) activation patches; prep holds pre-padded bf16 weights + BN."""
    M, K = a.shape
    wp, scale_p, shift_p = prep["wp"], prep["scale"], prep["shift"]
    tk, tn, n_true = prep["tk"], prep["tn"], prep["cout"]
    Kp, Np = wp.shape
    tm, Mp = _tile(M, _TM, 8)

    a_b = a.astype(jnp.bfloat16)
    if Mp != M or Kp != K:
        a_b = jnp.pad(a_b, ((0, Mp - M), (0, Kp - K)))

    grid = (Mp // tm, Np // tn, Kp // tk)
    in_specs = [
        pl.BlockSpec((tm, tk), lambda i, j, k: (i, k)),
        pl.BlockSpec((tk, tn), lambda i, j, k: (k, j)),
        pl.BlockSpec((1, tn), lambda i, j, k: (0, j)),
        pl.BlockSpec((1, tn), lambda i, j, k: (0, j)),
    ]
    args = [a_b, wp, scale_p, shift_p]

    if residual is not None:
        r_b = residual.astype(jnp.bfloat16)
        if Mp != M or Np != n_true:
            r_b = jnp.pad(r_b, ((0, Mp - M), (0, Np - n_true)))
        in_specs.append(pl.BlockSpec((tm, tn), lambda i, j, k: (i, j)))
        args.append(r_b)
        kernel = _mm_bn_add_relu_kernel
    else:
        kernel = functools.partial(_mm_bn_kernel, relu=relu)

    out = pl.pallas_call(
        kernel,
        out_shape=jax.ShapeDtypeStruct((Mp, Np), jnp.bfloat16),
        grid_spec=pltpu.PrefetchScalarGridSpec(
            num_scalar_prefetch=0,
            grid=grid,
            in_specs=in_specs,
            out_specs=pl.BlockSpec((tm, tn), lambda i, j, k: (i, j)),
            scratch_shapes=[pltpu.VMEM((tm, tn), jnp.float32)],
        ),
        compiler_params=pltpu.CompilerParams(
            dimension_semantics=("parallel", "parallel", "arbitrary"),
            vmem_limit_bytes=_VMEM_LIMIT,
        ),
    )(*args)
    if Mp != M or Np != n_true:
        out = out[:M, :n_true]
    return out


def im2col(x, kh, kw, stride, pad):
    """x: NHWC -> patches (N*OH*OW, kh*kw*C) ordered (tap-major, then channel)."""
    n, h, w, c = x.shape
    if pad:
        x = jnp.pad(x, ((0, 0), (pad, pad), (pad, pad), (0, 0)))
    hp, wp = h + 2 * pad, w + 2 * pad
    oh = (hp - kh) // stride + 1
    ow = (wp - kw) // stride + 1
    cols = []
    for i in range(kh):
        for j in range(kw):
            cols.append(
                x[:, i:i + stride * (oh - 1) + 1:stride,
                  j:j + stride * (ow - 1) + 1:stride, :])
    p = jnp.stack(cols, axis=3)  # (N, OH, OW, kh*kw, C)
    return p.reshape(n * oh * ow, kh * kw * c), (n, oh, ow)


def conv_bn(x, prep, *, relu=True, residual=None):
    """Conv2d + folded BN (+ residual/ReLU) using the fused Pallas matmul."""
    kh, kw, s = prep["kh"], prep["kw"], prep["stride"]
    n = x.shape[0]
    if kh == 1 and kw == 1:
        if s > 1:
            x = x[:, ::s, ::s, :]
        _, oh, ow, c = x.shape
        a = x.reshape(n * oh * ow, c)          # 1x1 conv: no im2col expansion
    else:
        a, (n, oh, ow) = im2col(x, kh, kw, s, prep["pad"])
    res = None if residual is None else residual.reshape(-1, prep["cout"])
    out = matmul_bn(a, prep, relu=relu, residual=res)
    return out.reshape(n, oh, ow, prep["cout"])


def maxpool_3x3_s2_p1(x):
    """nn.MaxPool2d(kernel_size=3, stride=2, padding=1). x: NHWC bf16."""
    n, h, w, c = x.shape
    xp = jnp.pad(x, ((0, 0), (1, 1), (1, 1), (0, 0)),
                 constant_values=-jnp.inf)
    oh = (h + 2 - 3) // 2 + 1
    ow = (w + 2 - 3) // 2 + 1
    cols = []
    for i in range(3):
        for j in range(3):
            cols.append(xp[:, i:i + 2 * (oh - 1) + 1:2,
                           j:j + 2 * (ow - 1) + 1:2, :])
    p = jnp.stack(cols, axis=0).reshape(9, n * oh * ow, c)
    m = n * oh * ow

    # Lane-dense output: fold rows into the lane axis when C < 128.
    f = 128 // c if (c < 128 and 128 % c == 0) else 1
    cf = c * f
    m2_raw = -(-m // f)
    tile, m2p = _tile(m2_raw, 1024, 8)
    if m2p * f != m:
        p = jnp.pad(p, ((0, 0), (0, m2p * f - m), (0, 0)),
                    constant_values=-jnp.inf)
    p = p.reshape(9, m2p, cf)

    out = pl.pallas_call(
        _maxpool9_kernel,
        out_shape=jax.ShapeDtypeStruct((m2p, cf), x.dtype),
        grid_spec=pl.GridSpec(
            grid=(m2p // tile,),
            in_specs=[pl.BlockSpec((9, tile, cf), lambda i: (0, i, 0))],
            out_specs=pl.BlockSpec((tile, cf), lambda i: (i, 0)),
        ),
        compiler_params=pltpu.CompilerParams(
            dimension_semantics=("parallel",),
            vmem_limit_bytes=_VMEM_LIMIT,
        ),
    )(p)
    return out.reshape(m2p * f, c)[:m].reshape(n, oh, ow, c)


# ----------------------------------------------------------------------------
# Deterministic parameter construction (ResNet-50 topology), pre-folded BN,
# pre-transposed / pre-padded bf16 weight matrices (done once, not per call).
# ----------------------------------------------------------------------------
class _ParamGen:
    def __init__(self, key):
        self._key = key
        self._i = 0

    def next(self):
        self._i += 1
        return jax.random.fold_in(self._key, self._i)


def _prep_conv_bn(pg, cout, cin, kh, kw, *, stride, pad):
    fan_in = cin * kh * kw
    w = jax.random.normal(pg.next(), (cout, cin, kh, kw),
                          jnp.float32) * (2.0 / fan_in) ** 0.5
    gamma = 1.0 + 0.1 * jax.random.normal(pg.next(), (cout,), jnp.float32)
    beta = 0.1 * jax.random.normal(pg.next(), (cout,), jnp.float32)
    mean = 0.1 * jax.random.normal(pg.next(), (cout,), jnp.float32)
    var = 1.0 + 0.1 * jnp.abs(jax.random.normal(pg.next(), (cout,), jnp.float32))
    eps = 1e-5
    scale = gamma / jnp.sqrt(var + eps)
    shift = beta - mean * scale

    K, N = kh * kw * cin, cout
    tk, kp = _tile_k(K)
    tn, np_ = _tile(N, _TN, 128)
    wmat = jnp.transpose(w, (2, 3, 1, 0)).reshape(K, N).astype(jnp.bfloat16)
    wp = wmat if (kp == K and np_ == N) else jnp.pad(
        wmat, ((0, kp - K), (0, np_ - N)))
    scale_p = jnp.pad(scale.reshape(1, -1), ((0, 0), (0, np_ - N)))
    shift_p = jnp.pad(shift.reshape(1, -1), ((0, 0), (0, np_ - N)))
    return dict(wp=wp, scale=scale_p, shift=shift_p, tk=tk, tn=tn,
                cout=cout, kh=kh, kw=kw, stride=stride, pad=pad)


def build_resnet50_params(key):
    pg = _ParamGen(key)
    params = {"stem": _prep_conv_bn(pg, 64, 3, 7, 7, stride=2, pad=3)}
    layer_cfg = [(64, 3, 1), (128, 4, 2), (256, 6, 2), (512, 3, 2)]
    in_ch = 64
    for li, (width, nblocks, stride) in enumerate(layer_cfg, start=1):
        blocks = []
        for bi in range(nblocks):
            s = stride if bi == 0 else 1
            blk = {
                "c1": _prep_conv_bn(pg, width, in_ch, 1, 1, stride=1, pad=0),
                "c2": _prep_conv_bn(pg, width, width, 3, 3, stride=s, pad=1),
                "c3": _prep_conv_bn(pg, width * 4, width, 1, 1, stride=1, pad=0),
            }
            if s != 1 or in_ch != width * 4:
                blk["ds"] = _prep_conv_bn(pg, width * 4, in_ch, 1, 1,
                                          stride=s, pad=0)
            blocks.append(blk)
            in_ch = width * 4
        params[f"layer{li}"] = blocks
    return params


# ----------------------------------------------------------------------------
# Forward pass (mirrors ResNetConv.forward)
# ----------------------------------------------------------------------------
def _bottleneck(x, blk):
    if "ds" in blk:
        identity = conv_bn(x, blk["ds"], relu=False)
    else:
        identity = x
    out = conv_bn(x, blk["c1"], relu=True)
    out = conv_bn(out, blk["c2"], relu=True)
    # conv3 + bn3 + residual add + relu fused into one Pallas kernel
    out = conv_bn(out, blk["c3"], relu=False, residual=identity)
    return out


def resnet_conv_forward(x_nchw, params, n_blocks=4):
    x = jnp.transpose(x_nchw, (0, 2, 3, 1)).astype(jnp.bfloat16)  # NCHW -> NHWC
    x = conv_bn(x, params["stem"], relu=True)      # conv1 + bn1 + relu
    x = maxpool_3x3_s2_p1(x)                        # maxpool
    for li in range(1, 5):
        if n_blocks >= li:
            for blk in params[f"layer{li}"]:
                x = _bottleneck(x, blk)
    return jnp.transpose(x, (0, 3, 1, 2)).astype(jnp.float32)   # NHWC -> NCHW


# ----------------------------------------------------------------------------
if __name__ == "__main__":
    key = jax.random.PRNGKey(0)
    params = build_resnet50_params(key)
    # small input consistent with the module: NCHW, 3 input channels
    x = jax.random.normal(jax.random.fold_in(key, 12345), (2, 3, 64, 64),
                          jnp.float32)
    out = resnet_conv_forward(x, params, n_blocks=4)
    out = jax.block_until_ready(out)
    assert out.shape == (2, 2048, 2, 2), out.shape
    assert bool(jnp.all(jnp.isfinite(out)))
    print("KERNEL_OK")
</pallas_src>

<mosaic_0001>
module attributes {stable_mosaic.version = 11 : i64} {
  func.func @_mm_bn_kernel(%arg0: i32, %arg1: i32, %arg2: i32, %arg3: memref<512x256xbf16, #tpu.memory_space<vmem>>, %arg4: memref<256x128xbf16, #tpu.memory_space<vmem>>, %arg5: memref<1x128xf32, #tpu.memory_space<vmem>>, %arg6: memref<1x128xf32, #tpu.memory_space<vmem>>, %arg7: memref<512x128xbf16, #tpu.memory_space<vmem>>, %arg8: memref<512x128xf32, #tpu.memory_space<vmem>>) attributes {dimension_semantics = [#tpu.dimension_semantics<parallel>, #tpu.dimension_semantics<parallel>, #tpu.dimension_semantics<arbitrary>], iteration_bounds = array<i64: 4, 1, 1>, scalar_prefetch = 0 : i64, scratch_operands = 1 : i64, tpu.core_type = #tpu.core_type<tc>, window_params = [{transform_indices = @transform_0, window_bounds = array<i64: 512, 256>}, {transform_indices = @transform_1, window_bounds = array<i64: 256, 128>}, {transform_indices = @transform_2, window_bounds = array<i64: 1, 128>}, {transform_indices = @transform_3, window_bounds = array<i64: 1, 128>}, {transform_indices = @transform_4, window_bounds = array<i64: 512, 128>}]} {
    %c0_i32 = arith.constant 0 : i32
    %0 = arith.cmpi eq, %arg2, %c0_i32 : i32
    %1 = arith.extui %0 : i1 to i32
    %c0_i32_0 = arith.constant 0 : i32
    %2 = arith.cmpi ne, %1, %c0_i32_0 : i32
    scf.if %2 {
      %cst_10 = arith.constant 0.000000e+00 : f32
      %12 = vector.broadcast %cst_10 : f32 to vector<512x128xf32>
      %c0_11 = arith.constant 0 : index
      %c0_12 = arith.constant 0 : index
      %13 = vector.load %arg8[%c0_11, %c0_12] : memref<512x128xf32, #tpu.memory_space<vmem>>, vector<512x128xf32>
      tpu.vector_store %arg8[%c0_11, %c0_12], %12 {strides = array<i32>} : memref<512x128xf32, #tpu.memory_space<vmem>>, vector<512x128xf32>,
    } else {
    }
    %c0 = arith.constant 0 : index
    %c0_1 = arith.constant 0 : index
    %3 = vector.load %arg8[%c0, %c0_1] : memref<512x128xf32, #tpu.memory_space<vmem>>, vector<512x128xf32>
    %c0_2 = arith.constant 0 : index
    %c0_3 = arith.constant 0 : index
    %4 = vector.load %arg3[%c0_2, %c0_3] : memref<512x256xbf16, #tpu.memory_space<vmem>>, vector<512x256xbf16>
    %c0_4 = arith.constant 0 : index
    %c0_5 = arith.constant 0 : index
    %5 = vector.load %arg4[%c0_4, %c0_5] : memref<256x128xbf16, #tpu.memory_space<vmem>>, vector<256x128xbf16>
    %cst = arith.constant dense<0.000000e+00> : vector<512x128xf32>
    %6 = tpu.matmul %4, %5, %cst {dimension_numbers = #tpu.dot_dimension_numbers<[1], [0], [0], [1], [0, 0, 1, 1], [], []>} : vector<512x256xbf16>, vector<256x128xbf16>, vector<512x128xf32> -> vector<512x128xf32>
    %7 = arith.addf %3, %6 : vector<512x128xf32>
    %c0_6 = arith.constant 0 : index
    %c0_7 = arith.constant 0 : index
    %8 = vector.load %arg8[%c0_6, %c0_7] : memref<512x128xf32, #tpu.memory_space<vmem>>, vector<512x128xf32>
    tpu.vector_store %arg8[%c0_6, %c0_7], %7 {strides = array<i32>} : memref<512x128xf32, #tpu.memory_space<vmem>>, vector<512x128xf32>,
    %c0_i32_8 = arith.constant 0 : i32
    %9 = arith.cmpi eq, %arg2, %c0_i32_8 : i32
    %10 = arith.extui %9 : i1 to i32
    %c0_i32_9 = arith.constant 0 : i32
    %11 = arith.cmpi ne, %10, %c0_i32_9 : i32
    scf.if %11 {
      %c0_10 = arith.constant 0 : index
      %c0_11 = arith.constant 0 : index
      %12 = vector.load %arg8[%c0_10, %c0_11] : memref<512x128xf32, #tpu.memory_space<vmem>>, vector<512x128xf32>
      %c0_12 = arith.constant 0 : index
      %c0_13 = arith.constant 0 : index
      %13 = vector.load %arg5[%c0_12, %c0_13] : memref<1x128xf32, #tpu.memory_space<vmem>>, vector<1x128xf32>
      %14 = vector.broadcast %13 : vector<1x128xf32> to vector<512x128xf32>
      %15 = arith.mulf %12, %14 : vector<512x128xf32>
      %c0_14 = arith.constant 0 : index
      %c0_15 = arith.constant 0 : index
      %16 = vector.load %arg6[%c0_14, %c0_15] : memref<1x128xf32, #tpu.memory_space<vmem>>, vector<1x128xf32>
      %17 = vector.broadcast %16 : vector<1x128xf32> to vector<512x128xf32>
      %18 = arith.addf %15, %17 : vector<512x128xf32>
      %cst_16 = arith.constant 0.000000e+00 : f32
      %19 = vector.broadcast %cst_16 : f32 to vector<512x128xf32>
      %20 = arith.maximumf %18, %19 : vector<512x128xf32>
      %21 = arith.truncf %20 : vector<512x128xf32> to vector<512x128xbf16>
      %c0_17 = arith.constant 0 : index
      %c0_18 = arith.constant 0 : index
      %22 = vector.load %arg7[%c0_17, %c0_18] : memref<512x128xbf16, #tpu.memory_space<vmem>>, vector<512x128xbf16>
      tpu.vector_store %arg7[%c0_17, %c0_18], %21 {strides = array<i32>} : memref<512x128xbf16, #tpu.memory_space<vmem>>, vector<512x128xbf16>,
    } else {
    }
    return
  }
  func.func @transform_0(%arg0: i32, %arg1: i32, %arg2: i32) -> (i32, i32) {
    %c0_i32 = arith.constant 0 : i32
    return %arg0, %arg2 : i32, i32
  }
  func.func @transform_1(%arg0: i32, %arg1: i32, %arg2: i32) -> (i32, i32) {
    %c0_i32 = arith.constant 0 : i32
    return %arg2, %arg1 : i32, i32
  }
  func.func @transform_2(%arg0: i32, %arg1: i32, %arg2: i32) -> (i32, i32) {
    %c0_i32 = arith.constant 0 : i32
    %c0_i32_0 = arith.constant 0 : i32
    return %c0_i32, %arg1 : i32, i32
  }
  func.func @transform_3(%arg0: i32, %arg1: i32, %arg2: i32) -> (i32, i32) {
    %c0_i32 = arith.constant 0 : i32
    %c0_i32_0 = arith.constant 0 : i32
    return %c0_i32, %arg1 : i32, i32
  }
  func.func @transform_4(%arg0: i32, %arg1: i32, %arg2: i32) -> (i32, i32) {
    %c0_i32 = arith.constant 0 : i32
    return %arg0, %arg1 : i32, i32
  }
}

</mosaic_0001>

<bundles_post_ra>
// kernel: tpu_custom_call.1
= control target key start
LH: loop header
LB: loop body
LE: loop exit
PB: predicated region body
PF: predicated region fallthrough
CT: control target
= control target key end

     0   :  { %9 = vsyncpa [#allocation4], 0  ;;  %s3415_s0 = inlined_call_operand.hbm [shape: bf16[2048,256], index: 0, kind: input, shape index: {}]   ;;  %s3416_s1 = inlined_call_operand.hbm [shape: bf16[256,128], index: 1, kind: input, shape index: {}]   ;;  %s3417_s2 = inlined_call_operand.vmem [shape: f32[1,128], index: 2, kind: input, shape index: {}]   ;;  %s3418_s3 = inlined_call_operand.vmem [shape: f32[1,128], index: 3, kind: input, shape index: {}]   ;;  %s3419_s4 = inlined_call_operand.hbm [shape: bf16[2048,128], index: 4, kind: output, shape index: {}]  }
   0x1   :  { %11 = vsyncpa [#allocation4 + $0x1], 0 }
   0x2   :  { %12 = vsyncpa [#allocation7], 0 }
   0x3   :  { %13 = vsyncpa [#allocation5], 0 }
   0x4   :  { %15 = vsyncpa [#allocation5 + $0x1], 0  ;;  %s2926_s15 = smov 0   ;;  %s2928_s16 = smov 0  }
   0x5   :  { %s2930_s17 = smov 0   ;;  %s2932_s18 = smov 0  }
   0x6   :  { %s2934_s19 = smov 0   ;;  %s2936_s20 = smov 0  }
   0x7 LB: > { %s2097_s21 = sadd.s32 4294967295, %s2889_s20   ;;  %s2098_s22 = sadd.s32 4294967294, %s2889_s20   ;;  %s2889_s20 = sphi %s2936_s20, %s21_s20   ;;  %s2885_s19 = sphi %s2934_s19, %s3442_s19   ;;  %s2881_s18 = sphi %s2932_s18, %s3441_s18   ;;  %s2877_s17 = sphi %s2930_s17, %s3440_s17   ;;  %s2873_s16 = sphi %s2928_s16, %s3439_s16   ;;  %s2869_s15 = sphi %s2926_s15, %s3438_s15  }
   0x8   : > { %p62_p0 = scmp.ne.s32.totalorder %s2873_s16, %s2869_s15  ;;  %p2960_p1 = scmp.eq.s32.totalorder %s2097_s21, 0 }
   0x9   : > { %p2964_p2 = scmp.eq.s32.totalorder %s2097_s21, 3  ;;  %p174_p3 = scmp.eq.s32.totalorder %s2098_s22, 3 }
   0xa   : > { %s3424_s23 = scalar_select %p2960_p1, 1, 0 }
   0xb   : > { %s3425_s24 = scalar_select %p2964_p2, 1, 0 }
   0xc   : > { %p2970_p4 = por %p2960_p1, %p62_p0  ;;  %p2099_p5 = scmp.ge.s32.totalorder %s2889_s20, 1 }
   0xd   : > { %p2975_p6 = por %p174_p3, %p62_p0  ;;  %p181_p7 = scmp.lt.s32.totalorder %s2889_s20, 5 }
   0xe   : > { %s3426_s25 = scalar_select %p2970_p4, 1, 0 }
   0xf   : > { %s3427_s26 = scalar_select %p2975_p6, 1, 0 }
  0x10   : > { %p2980_p8 = pnand %p2099_p5, %p181_p7  ;;  %s2891_s28 = smov [#allocation6]  }
  0x11   : > { %s197_s29 = sshll.u32 %s2891_s28, 4  ;;  %s40_s5 = sadd.s32 1, %s2885_s19  ;;  %s198_s29 = int_to_ptr.vmem [resolvable:$true] %s197_s29 }
  0x12   : > { %s3428_s27 = scalar_select %p2980_p8, 1, 0 }
  0x13   : > { %p2561_p9 = pneg %p2980_p8  ;;  %s2745_s8 = scalar_lea.hbm %s3416_s1, 2048 }
  0x14   : > { %p2746_p11 = scmp.ne.s32.totalorder %s3416_s1, %s2745_s8  ;;  %p2752_p3 = scmp.lt.u32.totalorder %s2745_s8, %s3416_s1 }
  0x15   : > { %p2988_p10 = pnand %p2561_p9, %p2960_p1 }
  0x17   : > { %p2747_p12 = pneg %p2988_p10 }
  0x19   : > { %p2748_p13 = pnand %p2747_p12, %p2746_p11 }
  0x1b   : > { %p2749_p0 = pneg %p2748_p13 }
  0x1d   : > { %p2754_p5 = pnand %p2752_p3, %p2749_p0 }
  0x1f   : > { %2757 = shalt.err (!%p2754_p5)
}
  0x20   : > { %s2758_s13 = scalar_lea.vmem %s198_s29, 2048  ;;  %p2766_p1 = scmp.lt.s32.totalorder %s198_s29, %s198_s29 }
  0x21   : > { %p2759_p7 = scmp.ne.s32.totalorder %s198_s29, %s2758_s13  ;;  %p2767_p4 = scmp.lt.s32.totalorder %s2758_s13, %s2758_s13 }
  0x23   : > { %p2761_p9 = pnand %p2759_p7, %p2747_p12  ;;  %p2768_p8 = por %p2767_p4, %p2766_p1 }
  0x25   : > { %p2762_p6 = pneg %p2761_p9 }
  0x27   : > { %p2769_p2 = pnand %p2768_p8, %p2762_p6 }
  0x29   : > { %2772 = shalt.err (!%p2769_p2)
}
  0x2a   : > { %s2892_s14 = smov 64   ;;  %s2893_s21 = smov 4  }
  0x2b   : > { %2564 = dma.hbm_to_vmem [thread:$0]  (!%p2988_p10), %s3416_s1, 2048, %s198_s29, [#allocation7], %s2892_s14, %s2892_s14, %s2893_s21  }
  0x2c   : > { %p42_p1 = scmp.ge.s32.totalorder %s40_s5, 4  ;;  %s49_s6 = sadd.s32 1, %s2877_s17 }
  0x2d   : > { %p56_p2 = scmp.ne.s32.totalorder %s2877_s17, %s2873_s16  ;;  %p57_p4 = scmp.eq.s32.totalorder %s2889_s20, 0 }
  0x2e   : > { %s3444_s5 = smov (%p42_p1, %s40_s5), 0  ;;  %p3431_p8 = scmp.ne.s32.totalorder %s3425_s24, 0 }
  0x2f   : > { %p3015_p6 = por %p57_p4, %p56_p2  ;;  %s44_s30 = ssub.s32 %s2885_s19, %s3444_s5 }
  0x30   : > { %p3021_p11 = por %p3431_p8, %p56_p2  ;;  %p2574_p12 = scmp.lt.s32.totalorder %s2889_s20, 4 }
  0x31   : > { %p47_p10 = scmp.eq.s32.totalorder %s44_s30, 0  ;;  %s223_s29 = sand.u32 1, %s2877_s17  }
  0x32   : > { %s2104_s9 = sshll.u32 %s223_s29, 9  ;;  %s2264_s11 = sshll.u32 %s2885_s19, 13 }
  0x33   : > { %s3030_s10 = scalar_select %p47_p10, %s2877_s17, %s49_s6  }
  0x34   : > { %s3036_s14 = scalar_lea.hbm %s3415_s0, %s2264_s11  ;;  %s227_s24 = scalar_lea.vmem [#allocation3], %s2104_s9 }
  0x35   : > { %s237_s21 = sshll.u32 %s227_s24, 4  ;;  %p3042_p13 = pnand %p2574_p12, %p3015_p6  ;;  %s3038_s21 = int_to_ptr.vmem [resolvable:$true] %s237_s21 }
  0x36   : > { %s3046_s28 = scalar_lea.sflag [#allocation4], %s223_s29  ;;  %s2773_s6 = scalar_lea.hbm %s3036_s14, 8192 }
  0x37   : > { %p2774_p0 = scmp.ne.s32.totalorder %s3036_s14, %s2773_s6  ;;  %p2775_p3 = pneg %p3042_p13 }
  0x38   : > { %s2778_s7 = scalar_lea.hbm %s3415_s0, 32768  ;;  %p2779_p9 = scmp.lt.u32.totalorder %s3036_s14, %s3415_s0 }
  0x39   : > { %p2776_p5 = pnand %p2775_p3, %p2774_p0  ;;  %p2780_p1 = scmp.lt.u32.totalorder %s2778_s7, %s2773_s6 }
  0x3a   : > { %p2782_p4 = scmp.lt.u32.totalorder %s2773_s6, %s3036_s14 }
  0x3b   : > { %p2777_p7 = pneg %p2776_p5  ;;  %p2781_p2 = por %p2780_p1, %p2779_p9 }
  0x3d   : > { %p2783_p6 = por %p2782_p4, %p2781_p2 }
  0x3f   : > { %p2784_p8 = pnand %p2783_p6, %p2777_p7 }
  0x41   : > { %2787 = shalt.err (!%p2784_p8)
}
  0x42   : > { %s2788_s29 = scalar_lea.vmem %s3038_s21, 8192  ;;  %s2894_s13 = smov [#allocation3]  }
  0x43   : > { %p2789_p12 = scmp.ne.s32.totalorder %s3038_s21, %s2788_s29  ;;  %s2793_s24 = sshll.u32 %s2894_s13, 4  ;;  %s2794_s24 = int_to_ptr.vmem [resolvable:$false] %s2793_s24 }
  0x44   : > { %s2795_s30 = scalar_lea.vmem %s2794_s24, 16384  ;;  %p2796_p5 = scmp.lt.s32.totalorder %s3038_s21, %s2794_s24 }
  0x45   : > { %p2791_p10 = pnand %p2789_p12, %p2775_p3  ;;  %p2797_p9 = scmp.lt.s32.totalorder %s2795_s30, %s2788_s29 }
  0x47   : > { %p2792_p0 = pneg %p2791_p10  ;;  %p2798_p1 = por %p2797_p9, %p2796_p5 }
  0x49   : > { %p2799_p2 = pnand %p2798_p1, %p2792_p0 }
  0x4b   : > { %2802 = shalt.err (!%p2799_p2)
}
  0x4c   : > { %s2895_s6 = smov 128   ;;  %s2896_s9 = smov 8  }
  0x4d   : > { %2568 = dma.hbm_to_vmem [thread:$0]  (!%p3042_p13), %s3036_s14, 8192, %s3038_s21, %s3046_s28, %s2895_s6, %s2895_s6, %s2896_s9  }
  0x4e   : > { %p3434_p3 = scmp.ne.s32.totalorder %s3428_s27, 0 }
  0x4f   : > { %s3077_s7 = sand.u32 (!%p3434_p3), 1, %s2873_s16   ;;  %p3435_p7 = scmp.ne.s32.totalorder (!%p3434_p3), %s3426_s25, 0 }
  0x50   : > { %249 = sbr.rel (%p3434_p3) target bundleno = 514 (0x202), region = 36  ;;  %s2109_s11 = sshll.u32 (!%p3434_p3), %s3077_s7, 9 }
  0x51   : > { %s252_s12 = scalar_lea.sflag (!%p3434_p3), [#allocation4], %s3077_s7  ;;  %s3081_s29 = scalar_lea.vmem (!%p3434_p3), [#allocation3], %s2109_s11 }
  0x57   : > { %2856 = dma.done.wait (%p3435_p7), %s252_s12, 8192  }
  0x58   : > { %2858 = vsyncadd (%p3435_p7), %s252_s12, 4294959104  ;;  %p3436_p13 = scmp.ne.s32.totalorder %s3424_s23, 0 }
  0x5a   : > { %2860 = dma.done.wait (%p3436_p13), [#allocation7], 2048  }
  0x5b   : > { %2862 = vsyncadd (%p3436_p13), [#allocation7], 4294965248  ;;  %v2897_v0 = vmov 0   ;;  %v2633_v1 = vld [vmem:[#allocation6] sm:$0xff]   ;;  %v2634_v2 = vld [vmem:[#allocation6 + $0x8] sm:$0xff]   ;;  %s2111_s21 = sshll.u32 %s3077_s7, 8 }
  0x5c   : > { %945 = vmatprep.subr.bf16.mxu0 %v2897_v0  ;;  %2521 = vmatprep.subr.bf16.mxu1 %v2897_v0  ;;  %v2635_v3 = vld [vmem:[#allocation6 + $0x10] sm:$0xff]   ;;  %v2636_v4 = vld [vmem:[#allocation6 + $0x18] sm:$0xff]   ;;  %v2637_v5 = vld [vmem:[#allocation6 + $0x20] sm:$0xff]   ;;  %s3208_s22 = scalar_lea.vmem [#allocation8], %s2111_s21  ;;  %s2329_s28 = sshll.u32 %s2881_s18, 12 }
  0x5d   : > { %946 = vmatpush1.bf16.msra.mxu0 %v2633_v1  ;;  %2537 = vmatpush1.bf16.msra.mxu1 %v2633_v1  ;;  %v2651_v6 = vld [vmem:[%s3081_s29 + $0x4] ss:$8 sps:$4 sm:$0xff]   ;;  %v2639_v9 = vld [vmem:[#allocation6 + $0x30] sm:$0xff]   ;;  %v2640_v10 = vld [vmem:[#allocation6 + $0x38] sm:$0xff]   ;;  %s1970_s13 = sshll.u32 %s3208_s22, 4  ;;  %s3363_s6 = scalar_lea.hbm %s3419_s4, %s2329_s28  ;;  %s3365_s13 = int_to_ptr.vmem [resolvable:$true] %s1970_s13 }
  0x5e   : > { %947 = vmatprep.subr.bf16.mxu0 %v2897_v0  ;;  %2522 = vmatprep.subr.bf16.mxu1 %v2897_v0  ;;  %v2638_v7 = vld [vmem:[#allocation6 + $0x28] sm:$0xff]   ;;  %v2641_v11 = vld [vmem:[#allocation6 + $0x40] sm:$0xff]   ;;  %v2643_v13 = vld [vmem:[#allocation6 + $0x50] sm:$0xff]   ;;  %s1956_s18 = scalar_lea.sflag [#allocation5], %s3077_s7  ;;  %s2803_s9 = scalar_lea.vmem %s3365_s13, 4096 }
  0x5f   : > { %v2654_v8 = vld [vmem:[%s3081_s29 + $0x104] ss:$8 sps:$4 sm:$0xff]   ;;  %977 = vmatprep.mubr.bf16.mxu0 %v2651_v6  ;;  %v2644_v14 = vld [vmem:[#allocation6 + $0x58] sm:$0xff]   ;;  %v2647_v17 = vld [vmem:[#allocation6 + $0x70] sm:$0xff]   ;;  %p2804_p4 = scmp.ne.s32.totalorder %s3365_s13, %s2803_s9  ;;  %s2898_s11 = smov [#allocation8]  }
  0x60   : > { %1105 = vmatprep.mubr.bf16.mxu1 %v2654_v8  ;;  %v2642_v12 = vld [vmem:[#allocation6 + $0x48] sm:$0xff]   ;;  %v2645_v15 = vld [vmem:[#allocation6 + $0x60] sm:$0xff]   ;;  %v2648_v18 = vld [vmem:[#allocation6 + $0x78] sm:$0xff]   ;;  %s2807_s12 = sshll.u32 %s2898_s11, 4  ;;  %s2808_s12 = int_to_ptr.vmem [resolvable:$false] %s2807_s12 }
  0x61   : > { %948 = vmatpush1.bf16.msra.mxu0 %v2634_v2  ;;  %2538 = vmatpush1.bf16.msra.mxu1 %v2634_v2  ;;  %v2646_v16 = vld [vmem:[#allocation6 + $0x68] sm:$0xff]   ;;  %v2655_v21 = vld [vmem:[%s3081_s29 + $0x14] ss:$8 sps:$4 sm:$0xff]   ;;  %v2659_v23 = vld [vmem:[%s3081_s29 + $0x10] ss:$8 sps:$4 sm:$0xff]   ;;  %p2805_p6 = pnand %p2804_p4, %p3021_p11  ;;  %p2810_p12 = scmp.lt.s32.totalorder %s3365_s13, %s2808_s12 }
  0x62   : > { %949 = vmatprep.subr.bf16.mxu0 %v2897_v0  ;;  %2523 = vmatprep.subr.bf16.mxu1 %v2897_v0  ;;  %v2649_v19 = vld [vmem:[%s3081_s29] ss:$8 sps:$4 sm:$0xff]   ;;  %v2657_v22 = vld [vmem:[%s3081_s29 + $0x114] ss:$8 sps:$4 sm:$0xff]   ;;  %v2660_v24 = vld [vmem:[%s3081_s29 + $0x110] ss:$8 sps:$4 sm:$0xff]  }
  0x63   : > { %v2652_v20 = vld [vmem:[%s3081_s29 + $0x100] ss:$8 sps:$4 sm:$0xff]   ;;  %v2661_v25 = vld [vmem:[%s3081_s29 + $0x24] ss:$8 sps:$4 sm:$0xff]   ;;  %v2667_v29 = vld [vmem:[%s3081_s29 + $0x34] ss:$8 sps:$4 sm:$0xff]   ;;  %p2806_p8 = pneg %p2805_p6 }
  0x64   : > { %v2663_v26 = vld [vmem:[%s3081_s29 + $0x124] ss:$8 sps:$4 sm:$0xff]   ;;  %v2665_v27 = vld [vmem:[%s3081_s29 + $0x20] ss:$8 sps:$4 sm:$0xff]   ;;  %v2669_v30 = vld [vmem:[%s3081_s29 + $0x134] ss:$8 sps:$4 sm:$0xff]  }
  0x65   : > { %950 = vmatpush1.bf16.msra.mxu0 %v2635_v3  ;;  %2539 = vmatpush1.bf16.msra.mxu1 %v2635_v3  ;;  %v2666_v28 = vld [vmem:[%s3081_s29 + $0x120] ss:$8 sps:$4 sm:$0xff]   ;;  %v2671_v31 = vld [vmem:[%s3081_s29 + $0x30] ss:$8 sps:$4 sm:$0xff]   ;;  %v2673_v33 = vld [vmem:[%s3081_s29 + $0x44] ss:$8 sps:$4 sm:$0xff]  }
  0x66   : > { %951 = vmatprep.subr.bf16.mxu0 %v2897_v0  ;;  %2524 = vmatprep.subr.bf16.mxu1 %v2897_v0  ;;  %v2672_v32 = vld [vmem:[%s3081_s29 + $0x130] ss:$8 sps:$4 sm:$0xff]   ;;  %v2675_v34 = vld [vmem:[%s3081_s29 + $0x144] ss:$8 sps:$4 sm:$0xff]   ;;  %v2677_v35 = vld [vmem:[%s3081_s29 + $0x40] ss:$8 sps:$4 sm:$0xff]  }
  0x67   : > { %v2678_v36 = vld [vmem:[%s3081_s29 + $0x140] ss:$8 sps:$4 sm:$0xff]   ;;  %v2679_v37 = vld [vmem:[%s3081_s29 + $0x54] ss:$8 sps:$4 sm:$0xff]   ;;  %v2683_v39 = vld [vmem:[%s3081_s29 + $0x50] ss:$8 sps:$4 sm:$0xff]  }
  0x68   : > { %v2681_v38 = vld [vmem:[%s3081_s29 + $0x154] ss:$8 sps:$4 sm:$0xff]   ;;  %v2684_v40 = vld [vmem:[%s3081_s29 + $0x150] ss:$8 sps:$4 sm:$0xff]   ;;  %v2685_v41 = vld [vmem:[%s3081_s29 + $0x64] ss:$8 sps:$4 sm:$0xff]  }
  0x69   : > { %952 = vmatpush1.bf16.msra.mxu0 %v2636_v4  ;;  %2540 = vmatpush1.bf16.msra.mxu1 %v2636_v4  ;;  %v2687_v42 = vld [vmem:[%s3081_s29 + $0x164] ss:$8 sps:$4 sm:$0xff]   ;;  %v2689_v43 = vld [vmem:[%s3081_s29 + $0x60] ss:$8 sps:$4 sm:$0xff]   ;;  %v2691_v45 = vld [vmem:[%s3081_s29 + $0x74] ss:$8 sps:$4 sm:$0xff]  }
  0x6a   : > { %953 = vmatprep.subr.bf16.mxu0 %v2897_v0  ;;  %2525 = vmatprep.subr.bf16.mxu1 %v2897_v0  ;;  %v2690_v44 = vld [vmem:[%s3081_s29 + $0x160] ss:$8 sps:$4 sm:$0xff]   ;;  %v2693_v46 = vld [vmem:[%s3081_s29 + $0x174] ss:$8 sps:$4 sm:$0xff]   ;;  %v2695_v47 = vld [vmem:[%s3081_s29 + $0x70] ss:$8 sps:$4 sm:$0xff]  }
  0x6b   : > { %v2696_v48 = vld [vmem:[%s3081_s29 + $0x170] ss:$8 sps:$4 sm:$0xff]   ;;  %v2697_v49 = vld [vmem:[%s3081_s29 + $0x84] ss:$8 sps:$4 sm:$0xff]   ;;  %v2701_v51 = vld [vmem:[%s3081_s29 + $0x80] ss:$8 sps:$4 sm:$0xff]  }
  0x6c   : > { %v2699_v50 = vld [vmem:[%s3081_s29 + $0x184] ss:$8 sps:$4 sm:$0xff]   ;;  %v2702_v52 = vld [vmem:[%s3081_s29 + $0x180] ss:$8 sps:$4 sm:$0xff]   ;;  %v2703_v53 = vld [vmem:[%s3081_s29 + $0x94] ss:$8 sps:$4 sm:$0xff]  }
  0x6d   : > { %954 = vmatpush1.bf16.msra.mxu0 %v2637_v5  ;;  %2541 = vmatpush1.bf16.msra.mxu1 %v2637_v5  ;;  %v2705_v54 = vld [vmem:[%s3081_s29 + $0x194] ss:$8 sps:$4 sm:$0xff]   ;;  %v2707_v55 = vld [vmem:[%s3081_s29 + $0x90] ss:$8 sps:$4 sm:$0xff]   ;;  %v2709_v57 = vld [vmem:[%s3081_s29 + $0xa4] ss:$8 sps:$4 sm:$0xff]  }
  0x6e   : > { %955 = vmatprep.subr.bf16.mxu0 %v2897_v0  ;;  %2526 = vmatprep.subr.bf16.mxu1 %v2897_v0  ;;  %v2708_v56 = vld [vmem:[%s3081_s29 + $0x190] ss:$8 sps:$4 sm:$0xff]   ;;  %v2711_v58 = vld [vmem:[%s3081_s29 + $0x1a4] ss:$8 sps:$4 sm:$0xff]   ;;  %v2713_v59 = vld [vmem:[%s3081_s29 + $0xa0] ss:$8 sps:$4 sm:$0xff]  }
  0x6f   : > { %v2714_v60 = vld [vmem:[%s3081_s29 + $0x1a0] ss:$8 sps:$4 sm:$0xff]   ;;  %v2715_v61 = vld [vmem:[%s3081_s29 + $0xb4] ss:$8 sps:$4 sm:$0xff]   ;;  %v2719_v63 = vld [vmem:[%s3081_s29 + $0xb0] ss:$8 sps:$4 sm:$0xff]  }
  0x70   : > { %v2717_v62 = vld [vmem:[%s3081_s29 + $0x1b4] ss:$8 sps:$4 sm:$0xff]   ;;  %v2721_v1 = vld [vmem:[%s3081_s29 + $0xc4] ss:$8 sps:$4 sm:$0xff]   ;;  %v2725_v3 = vld [vmem:[%s3081_s29 + $0xc0] ss:$8 sps:$4 sm:$0xff]  }
  0x71   : > { %956 = vmatpush1.bf16.msra.mxu0 %v2638_v7  ;;  %2542 = vmatpush1.bf16.msra.mxu1 %v2638_v7  ;;  %v2723_v2 = vld [vmem:[%s3081_s29 + $0x1c4] ss:$8 sps:$4 sm:$0xff]   ;;  %v2726_v4 = vld [vmem:[%s3081_s29 + $0x1c0] ss:$8 sps:$4 sm:$0xff]   ;;  %v2727_v5 = vld [vmem:[%s3081_s29 + $0xd4] ss:$8 sps:$4 sm:$0xff]  }
  0x72   : > { %957 = vmatprep.subr.bf16.mxu0 %v2897_v0  ;;  %2527 = vmatprep.subr.bf16.mxu1 %v2897_v0  ;;  %v2729_v6 = vld [vmem:[%s3081_s29 + $0x1d4] ss:$8 sps:$4 sm:$0xff]   ;;  %v2731_v7 = vld [vmem:[%s3081_s29 + $0xd0] ss:$8 sps:$4 sm:$0xff]  }
  0x73   : > { %v2732_v8 = vld [vmem:[%s3081_s29 + $0x1d0] ss:$8 sps:$4 sm:$0xff]  }
  0x75   : > { %958 = vmatpush1.bf16.msra.mxu0 %v2639_v9  ;;  %2543 = vmatpush1.bf16.msra.mxu1 %v2639_v9  ;;  %v2733_v9 = vld [vmem:[%s3081_s29 + $0xe4] ss:$8 sps:$4 sm:$0xff]  }
  0x76   : > { %959 = vmatprep.subr.bf16.mxu0 %v2897_v0  ;;  %2528 = vmatprep.subr.bf16.mxu1 %v2897_v0 }
  0x79   : > { %960 = vmatpush1.bf16.msra.mxu0 %v2640_v10  ;;  %2544 = vmatpush1.bf16.msra.mxu1 %v2640_v10  ;;  %v2735_v10 = vld [vmem:[%s3081_s29 + $0x1e4] ss:$8 sps:$4 sm:$0xff]  }
  0x7a   : > { %961 = vmatprep.subr.bf16.mxu0 %v2897_v0  ;;  %2529 = vmatprep.subr.bf16.mxu1 %v2897_v0 }
  0x7d   : > { %962 = vmatpush1.bf16.msra.mxu0 %v2641_v11  ;;  %2545 = vmatpush1.bf16.msra.mxu1 %v2641_v11  ;;  %v2737_v11 = vld [vmem:[%s3081_s29 + $0xe0] ss:$8 sps:$4 sm:$0xff]  }
  0x7e   : > { %963 = vmatprep.subr.bf16.mxu0 %v2897_v0  ;;  %2530 = vmatprep.subr.bf16.mxu1 %v2897_v0 }
  0x81   : > { %964 = vmatpush1.bf16.msra.mxu0 %v2642_v12  ;;  %2546 = vmatpush1.bf16.msra.mxu1 %v2642_v12  ;;  %v2738_v12 = vld [vmem:[%s3081_s29 + $0x1e0] ss:$8 sps:$4 sm:$0xff]  }
  0x82   : > { %965 = vmatprep.subr.bf16.mxu0 %v2897_v0  ;;  %2531 = vmatprep.subr.bf16.mxu1 %v2897_v0 }
  0x85   : > { %966 = vmatpush1.bf16.msra.mxu0 %v2643_v13  ;;  %2547 = vmatpush1.bf16.msra.mxu1 %v2643_v13  ;;  %v2739_v13 = vld [vmem:[%s3081_s29 + $0xf4] ss:$8 sps:$4 sm:$0xff]  }
  0x86   : > { %967 = vmatprep.subr.bf16.mxu0 %v2897_v0  ;;  %2532 = vmatprep.subr.bf16.mxu1 %v2897_v0 }
  0x89   : > { %968 = vmatpush1.bf16.msra.mxu0 %v2644_v14  ;;  %2548 = vmatpush1.bf16.msra.mxu1 %v2644_v14  ;;  %v2741_v14 = vld [vmem:[%s3081_s29 + $0x1f4] ss:$8 sps:$4 sm:$0xff]  }
  0x8a   : > { %969 = vmatprep.subr.bf16.mxu0 %v2897_v0  ;;  %2533 = vmatprep.subr.bf16.mxu1 %v2897_v0 }
  0x8d   : > { %970 = vmatpush1.bf16.msra.mxu0 %v2645_v15  ;;  %2549 = vmatpush1.bf16.msra.mxu1 %v2645_v15  ;;  %v2743_v15 = vld [vmem:[%s3081_s29 + $0xf0] ss:$8 sps:$4 sm:$0xff]  }
  0x8e   : > { %971 = vmatprep.subr.bf16.mxu0 %v2897_v0  ;;  %2534 = vmatprep.subr.bf16.mxu1 %v2897_v0 }
  0x91   : > { %972 = vmatpush1.bf16.msra.mxu0 %v2646_v16  ;;  %2550 = vmatpush1.bf16.msra.mxu1 %v2646_v16  ;;  %v2744_v16 = vld [vmem:[%s3081_s29 + $0x1f0] ss:$8 sps:$4 sm:$0xff]  }
  0x92   : > { %973 = vmatprep.subr.bf16.mxu0 %v2897_v0  ;;  %2535 = vmatprep.subr.bf16.mxu1 %v2897_v0 }
  0x95   : > { %974 = vmatpush1.bf16.msra.mxu0 %v2647_v17  ;;  %2551 = vmatpush1.bf16.msra.mxu1 %v2647_v17  ;;  %v3190_v17 = vld [vmem:[%s3417_s2] ss:$0 sm:$0xff] }
  0x96   : > { %975 = vmatprep.subr.bf16.mxu0 %v2897_v0  ;;  %2536 = vmatprep.subr.bf16.mxu1 %v2897_v0  ;;  %v2720_v0 = vld [vmem:[%s3081_s29 + $0x1b0] ss:$8 sps:$4 sm:$0xff]   ;;  %s2809_s29 = scalar_lea.vmem %s2808_s12, 8192 }
  0x97   : > { %p2811_p10 = scmp.lt.s32.totalorder %s2809_s29, %s2803_s9 }
  0x99   : > { %976 = vmatpush1.bf16.msra.mxu0 %v2648_v18  ;;  %2552 = vmatpush1.bf16.msra.mxu1 %v2648_v18  ;;  %p2812_p0 = por %p2811_p10, %p2810_p12 }
  0x9b   : > { %p2813_p5 = pnand %p2812_p0, %p2806_p8 }
  0x9c   : > { %978 = vmatmul.mubr.bf16.vlgmr.msra.gmra.mrb[0].mxu0 %v2649_v19  ;;  %1106 = vmatmul.mubr.bf16.vlgmr.msra.gmra.mrb[0].mxu1 %v2652_v20  ;;  %v3195_v19 = vld [vmem:[%s3418_s3] ss:$0 sm:$0xff] }
  0x9d   : > { %985 = vmatprep.mubr.bf16.mxu0 %v2655_v21  ;;  %1113 = vmatprep.mubr.bf16.mxu1 %v2657_v22 }
  0xa4   : > { %986 = vmatmul.mubr.bf16.gmra.mrb[4].mxu0 %v2659_v23  ;;  %1114 = vmatmul.mubr.bf16.gmra.mrb[4].mxu1 %v2660_v24 }
  0xa5   : > { %993 = vmatprep.mubr.bf16.mxu0 %v2661_v25  ;;  %1121 = vmatprep.mubr.bf16.mxu1 %v2663_v26 }
  0xac   : > { %994 = vmatmul.mubr.bf16.gmra.mrb[8].mxu0 %v2665_v27  ;;  %1122 = vmatmul.mubr.bf16.gmra.mrb[8].mxu1 %v2666_v28 }
  0xad   : > { %1001 = vmatprep.mubr.bf16.mxu0 %v2667_v29  ;;  %1129 = vmatprep.mubr.bf16.mxu1 %v2669_v30 }
  0xb4   : > { %1002 = vmatmul.mubr.bf16.gmra.mrb[12].mxu0 %v2671_v31  ;;  %1130 = vmatmul.mubr.bf16.gmra.mrb[12].mxu1 %v2672_v32 }
  0xb5   : > { %1009 = vmatprep.mubr.bf16.mxu0 %v2673_v33  ;;  %1137 = vmatprep.mubr.bf16.mxu1 %v2675_v34 }
  0xbc   : > { %1010 = vmatmul.mubr.bf16.gmra.mrb[16].mxu0 %v2677_v35  ;;  %1138 = vmatmul.mubr.bf16.gmra.mrb[16].mxu1 %v2678_v36 }
  0xbd   : > { %1017 = vmatprep.mubr.bf16.mxu0 %v2679_v37  ;;  %1145 = vmatprep.mubr.bf16.mxu1 %v2681_v38 }
  0xc4   : > { %1018 = vmatmul.mubr.bf16.gmra.mrb[20].mxu0 %v2683_v39  ;;  %1146 = vmatmul.mubr.bf16.gmra.mrb[20].mxu1 %v2684_v40 }
  0xc5   : > { %1025 = vmatprep.mubr.bf16.mxu0 %v2685_v41  ;;  %1153 = vmatprep.mubr.bf16.mxu1 %v2687_v42 }
  0xcc   : > { %1026 = vmatmul.mubr.bf16.gmra.mrb[24].mxu0 %v2689_v43  ;;  %1154 = vmatmul.mubr.bf16.gmra.mrb[24].mxu1 %v2690_v44 }
  0xcd   : > { %1033 = vmatprep.mubr.bf16.mxu0 %v2691_v45  ;;  %1161 = vmatprep.mubr.bf16.mxu1 %v2693_v46 }
  0xd4   : > { %1034 = vmatmul.mubr.bf16.gmra.mrb[28].mxu0 %v2695_v47  ;;  %1162 = vmatmul.mubr.bf16.gmra.mrb[28].mxu1 %v2696_v48 }
  0xd5   : > { %1041 = vmatprep.mubr.bf16.mxu0 %v2697_v49  ;;  %1169 = vmatprep.mubr.bf16.mxu1 %v2699_v50 }
  0xdc   : > { %1042 = vmatmul.mubr.bf16.gmra.mrb[32].mxu0 %v2701_v51  ;;  %1170 = vmatmul.mubr.bf16.gmra.mrb[32].mxu1 %v2702_v52 }
  0xdd   : > { %1049 = vmatprep.mubr.bf16.mxu0 %v2703_v53  ;;  %1177 = vmatprep.mubr.bf16.mxu1 %v2705_v54 }
  0xe4   : > { %1050 = vmatmul.mubr.bf16.gmra.mrb[36].mxu0 %v2707_v55  ;;  %1178 = vmatmul.mubr.bf16.gmra.mrb[36].mxu1 %v2708_v56 }
  0xe5   : > { %1057 = vmatprep.mubr.bf16.mxu0 %v2709_v57  ;;  %1185 = vmatprep.mubr.bf16.mxu1 %v2711_v58 }
  0xec   : > { %1058 = vmatmul.mubr.bf16.gmra.mrb[40].mxu0 %v2713_v59  ;;  %1186 = vmatmul.mubr.bf16.gmra.mrb[40].mxu1 %v2714_v60 }
  0xed   : > { %1065 = vmatprep.mubr.bf16.mxu0 %v2715_v61  ;;  %1193 = vmatprep.mubr.bf16.mxu1 %v2717_v62 }
  0xf4   : > { %1066 = vmatmul.mubr.bf16.gmra.mrb[44].mxu0 %v2719_v63  ;;  %1194 = vmatmul.mubr.bf16.gmra.mrb[44].mxu1 %v2720_v0 }
  0xf5   : > { %1073 = vmatprep.mubr.bf16.mxu0 %v2721_v1  ;;  %1201 = vmatprep.mubr.bf16.mxu1 %v2723_v2 }
  0xfc   : > { %1074 = vmatmul.mubr.bf16.gmra.mrb[48].mxu0 %v2725_v3  ;;  %1202 = vmatmul.mubr.bf16.gmra.mrb[48].mxu1 %v2726_v4 }
  0xfd   : > { %1081 = vmatprep.mubr.bf16.mxu0 %v2727_v5  ;;  %1209 = vmatprep.mubr.bf16.mxu1 %v2729_v6 }
 0x104   : > { %1082 = vmatmul.mubr.bf16.gmra.mrb[52].mxu0 %v2731_v7  ;;  %1210 = vmatmul.mubr.bf16.gmra.mrb[52].mxu1 %v2732_v8 }
 0x105   : > { %1089 = vmatprep.mubr.bf16.mxu0 %v2733_v9  ;;  %1217 = vmatprep.mubr.bf16.mxu1 %v2735_v10 }
 0x10c   : > { %1090 = vmatmul.mubr.bf16.gmra.mrb[56].mxu0 %v2737_v11  ;;  %1218 = vmatmul.mubr.bf16.gmra.mrb[56].mxu1 %v2738_v12 }
 0x10d   : > { %1097 = vmatprep.mubr.bf16.mxu0 %v2739_v13  ;;  %1225 = vmatprep.mubr.bf16.mxu1 %v2741_v14 }
 0x114   : > { %1098 = vmatmul.mubr.bf16.gmra.mrb[60].mxu0 %v2743_v15  ;;  %1226 = vmatmul.mubr.bf16.gmra.mrb[60].mxu1 %v2744_v16 }
 0x16f   : > { %v979_v18 = vpop.f32.mrb[0].mxu0  ;;  %v1107_v20 = vpop.f32.mrb[0].mxu1 }
 0x170   : > { %v1436_v21 = vmul.f32 %v3190_v17, %v979_v18  ;;  %v1468_v22 = vmul.f32 %v3190_v17, %v1107_v20  ;;  %v981_v23 = vpop.f32.mrb[1].mxu0  ;;  %v1109_v24 = vpop.f32.mrb[1].mxu1 }
 0x171   : > { %v982_v25 = vpop.f32.mrb[2].mxu0  ;;  %v1110_v26 = vpop.f32.mrb[2].mxu1 }
 0x172   : > { %v1507_v27 = vadd.f32 %v3195_v19, %v1436_v21  ;;  %v1539_v28 = vadd.f32 %v3195_v19, %v1468_v22  ;;  %v1437_v29 = vmul.f32 %v3190_v17, %v982_v25  ;;  %v1469_v30 = vmul.f32 %v3190_v17, %v1110_v26  ;;  %v984_v31 = vpop.f32.mrb[3].mxu0  ;;  %v1112_v32 = vpop.f32.mrb[3].mxu1 }
 0x174   : > { %v1508_v33 = vadd.f32 %v3195_v19, %v1437_v29  ;;  %v1540_v34 = vadd.f32 %v3195_v19, %v1469_v30  ;;  %v1571_v35 = vmax.f32 %v1507_v27, 0.0  ;;  %v1603_v36 = vmax.f32 %v1539_v28, 0.0 }
 0x176   : > { %v1572_v37 = vmax.f32 %v1508_v33, 0.0  ;;  %v1604_v38 = vmax.f32 %v1540_v34, 0.0 }
 0x177   : > { %v987_v39 = vpop.f32.mrb[4].mxu0  ;;  %v1115_v40 = vpop.f32.mrb[4].mxu1 }
 0x178   : > { %v2333_v41 = vpack.c.bf16 %v1572_v37, %v1571_v35  ;;  %v2413_v42 = vpack.c.bf16 %v1604_v38, %v1603_v36  ;;  %v1438_v43 = vmul.f32 %v3190_v17, %v987_v39  ;;  %v1470_v44 = vmul.f32 %v3190_v17, %v1115_v40  ;;  %v989_v45 = vpop.f32.mrb[5].mxu0  ;;  %v1117_v46 = vpop.f32.mrb[5].mxu1 }
 0x179   : > { %v990_v47 = vpop.f32.mrb[6].mxu0  ;;  %v1118_v48 = vpop.f32.mrb[6].mxu1 }
 0x17a   : > { %2334 = vst [vmem:[%s3208_s22] sm:$0xff] %v2333_v41   ;;  %2505 = vst [vmem:[%s3208_s22 + $0x80] sm:$0xff] %v2413_v42   ;;  %v1509_v49 = vadd.f32 %v3195_v19, %v1438_v43  ;;  %v1541_v50 = vadd.f32 %v3195_v19, %v1470_v44  ;;  %v1439_v51 = vmul.f32 %v3190_v17, %v990_v47  ;;  %v992_v53 = vpop.f32.mrb[7].mxu0  ;;  %v1120_v54 = vpop.f32.mrb[7].mxu1 }
 0x17b   : > { %v1471_v52 = vmul.f32 %v3190_v17, %v1118_v48 }
 0x17c   : > { %v1510_v55 = vadd.f32 %v3195_v19, %v1439_v51  ;;  %v1573_v57 = vmax.f32 %v1509_v49, 0.0  ;;  %v1605_v58 = vmax.f32 %v1541_v50, 0.0 }
 0x17d   : > { %v1542_v56 = vadd.f32 %v3195_v19, %v1471_v52 }
 0x17e   : > { %v1574_v59 = vmax.f32 %v1510_v55, 0.0 }
 0x17f   : > { %v1606_v60 = vmax.f32 %v1542_v56, 0.0  ;;  %v995_v61 = vpop.f32.mrb[8].mxu0  ;;  %v1123_v62 = vpop.f32.mrb[8].mxu1 }
 0x180   : > { %v2338_v63 = vpack.c.bf16 %v1574_v59, %v1573_v57  ;;  %v1440_v1 = vmul.f32 %v3190_v17, %v995_v61  ;;  %v1472_v2 = vmul.f32 %v3190_v17, %v1123_v62  ;;  %v997_v3 = vpop.f32.mrb[9].mxu0  ;;  %v1125_v4 = vpop.f32.mrb[9].mxu1 }
 0x181   : > { %v2418_v0 = vpack.c.bf16 %v1606_v60, %v1605_v58  ;;  %v998_v5 = vpop.f32.mrb[10].mxu0  ;;  %v1126_v6 = vpop.f32.mrb[10].mxu1 }
 0x182   : > { %2490 = vst [vmem:[%s3208_s22 + $0x8] sm:$0xff] %v2338_v63   ;;  %v1511_v7 = vadd.f32 %v3195_v19, %v1440_v1  ;;  %v1543_v8 = vadd.f32 %v3195_v19, %v1472_v2  ;;  %v1441_v9 = vmul.f32 %v3190_v17, %v998_v5  ;;  %v1473_v10 = vmul.f32 %v3190_v17, %v1126_v6  ;;  %v1000_v11 = vpop.f32.mrb[11].mxu0  ;;  %v1128_v12 = vpop.f32.mrb[11].mxu1 }
 0x183   : > { %2506 = vst [vmem:[%s3208_s22 + $0x88] sm:$0xff] %v2418_v0  }
 0x184   : > { %v1512_v13 = vadd.f32 %v3195_v19, %v1441_v9  ;;  %v1544_v14 = vadd.f32 %v3195_v19, %v1473_v10  ;;  %v1575_v15 = vmax.f32 %v1511_v7, 0.0  ;;  %v1607_v16 = vmax.f32 %v1543_v8, 0.0 }
 0x186   : > { %v1576_v18 = vmax.f32 %v1512_v13, 0.0  ;;  %v1608_v20 = vmax.f32 %v1544_v14, 0.0 }
 0x187   : > { %v1003_v21 = vpop.f32.mrb[12].mxu0  ;;  %v1131_v22 = vpop.f32.mrb[12].mxu1 }
 0x188   : > { %v2343_v23 = vpack.c.bf16 %v1576_v18, %v1575_v15  ;;  %v2423_v24 = vpack.c.bf16 %v1608_v20, %v1607_v16  ;;  %v1442_v25 = vmul.f32 %v3190_v17, %v1003_v21  ;;  %v1474_v26 = vmul.f32 %v3190_v17, %v1131_v22  ;;  %v1005_v27 = vpop.f32.mrb[13].mxu0  ;;  %v1133_v28 = vpop.f32.mrb[13].mxu1 }
 0x189   : > { %v1006_v29 = vpop.f32.mrb[14].mxu0  ;;  %v1134_v30 = vpop.f32.mrb[14].mxu1 }
 0x18a   : > { %2491 = vst [vmem:[%s3208_s22 + $0x10] sm:$0xff] %v2343_v23   ;;  %2507 = vst [vmem:[%s3208_s22 + $0x90] sm:$0xff] %v2423_v24   ;;  %v1513_v31 = vadd.f32 %v3195_v19, %v1442_v25  ;;  %v1545_v32 = vadd.f32 %v3195_v19, %v1474_v26  ;;  %v1443_v33 = vmul.f32 %v3190_v17, %v1006_v29  ;;  %v1008_v35 = vpop.f32.mrb[15].mxu0  ;;  %v1136_v36 = vpop.f32.mrb[15].mxu1 }
 0x18b   : > { %v1475_v34 = vmul.f32 %v3190_v17, %v1134_v30 }
 0x18c   : > { %v1514_v37 = vadd.f32 %v3195_v19, %v1443_v33  ;;  %v1577_v39 = vmax.f32 %v1513_v31, 0.0  ;;  %v1609_v40 = vmax.f32 %v1545_v32, 0.0 }
 0x18d   : > { %v1546_v38 = vadd.f32 %v3195_v19, %v1475_v34 }
 0x18e   : > { %v1578_v41 = vmax.f32 %v1514_v37, 0.0 }
 0x18f   : > { %v1610_v42 = vmax.f32 %v1546_v38, 0.0  ;;  %v1011_v43 = vpop.f32.mrb[16].mxu0  ;;  %v1139_v44 = vpop.f32.mrb[16].mxu1 }
 0x190   : > { %v2348_v45 = vpack.c.bf16 %v1578_v41, %v1577_v39  ;;  %v1444_v47 = vmul.f32 %v3190_v17, %v1011_v43  ;;  %v1476_v48 = vmul.f32 %v3190_v17, %v1139_v44  ;;  %v1013_v49 = vpop.f32.mrb[17].mxu0  ;;  %v1141_v50 = vpop.f32.mrb[17].mxu1 }
 0x191   : > { %v2428_v46 = vpack.c.bf16 %v1610_v42, %v1609_v40  ;;  %v1014_v51 = vpop.f32.mrb[18].mxu0  ;;  %v1142_v52 = vpop.f32.mrb[18].mxu1 }
 0x192   : > { %2492 = vst [vmem:[%s3208_s22 + $0x18] sm:$0xff] %v2348_v45   ;;  %v1515_v53 = vadd.f32 %v3195_v19, %v1444_v47  ;;  %v1547_v54 = vadd.f32 %v3195_v19, %v1476_v48  ;;  %v1445_v55 = vmul.f32 %v3190_v17, %v1014_v51  ;;  %v1477_v56 = vmul.f32 %v3190_v17, %v1142_v52  ;;  %v1016_v57 = vpop.f32.mrb[19].mxu0  ;;  %v1144_v58 = vpop.f32.mrb[19].mxu1 }
 0x193   : > { %2508 = vst [vmem:[%s3208_s22 + $0x98] sm:$0xff] %v2428_v46  }
 0x194   : > { %v1516_v59 = vadd.f32 %v3195_v19, %v1445_v55  ;;  %v1548_v60 = vadd.f32 %v3195_v19, %v1477_v56  ;;  %v1579_v61 = vmax.f32 %v1515_v53, 0.0  ;;  %v1611_v62 = vmax.f32 %v1547_v54, 0.0 }
 0x196   : > { %v1580_v63 = vmax.f32 %v1516_v59, 0.0  ;;  %v1612_v0 = vmax.f32 %v1548_v60, 0.0 }
 0x197   : > { %v1019_v1 = vpop.f32.mrb[20].mxu0  ;;  %v1147_v2 = vpop.f32.mrb[20].mxu1 }
 0x198   : > { %v2353_v3 = vpack.c.bf16 %v1580_v63, %v1579_v61  ;;  %v2433_v4 = vpack.c.bf16 %v1612_v0, %v1611_v62  ;;  %v1446_v5 = vmul.f32 %v3190_v17, %v1019_v1  ;;  %v1478_v6 = vmul.f32 %v3190_v17, %v1147_v2  ;;  %v1021_v7 = vpop.f32.mrb[21].mxu0  ;;  %v1149_v8 = vpop.f32.mrb[21].mxu1 }
 0x199   : > { %v1022_v9 = vpop.f32.mrb[22].mxu0  ;;  %v1150_v10 = vpop.f32.mrb[22].mxu1 }
 0x19a   : > { %2493 = vst [vmem:[%s3208_s22 + $0x20] sm:$0xff] %v2353_v3   ;;  %2509 = vst [vmem:[%s3208_s22 + $0xa0] sm:$0xff] %v2433_v4   ;;  %v1517_v11 = vadd.f32 %v3195_v19, %v1446_v5  ;;  %v1549_v12 = vadd.f32 %v3195_v19, %v1478_v6  ;;  %v1447_v13 = vmul.f32 %v3190_v17, %v1022_v9  ;;  %v1024_v15 = vpop.f32.mrb[23].mxu0  ;;  %v1152_v16 = vpop.f32.mrb[23].mxu1 }
 0x19b   : > { %v1479_v14 = vmul.f32 %v3190_v17, %v1150_v10 }
 0x19c   : > { %v1518_v18 = vadd.f32 %v3195_v19, %v1447_v13  ;;  %v1581_v21 = vmax.f32 %v1517_v11, 0.0  ;;  %v1613_v22 = vmax.f32 %v1549_v12, 0.0 }
 0x19d   : > { %v1550_v20 = vadd.f32 %v3195_v19, %v1479_v14 }
 0x19e   : > { %v1582_v23 = vmax.f32 %v1518_v18, 0.0 }
 0x19f   : > { %v1614_v24 = vmax.f32 %v1550_v20, 0.0  ;;  %v1027_v25 = vpop.f32.mrb[24].mxu0  ;;  %v1155_v26 = vpop.f32.mrb[24].mxu1 }
 0x1a0   : > { %v2358_v27 = vpack.c.bf16 %v1582_v23, %v1581_v21  ;;  %v1448_v29 = vmul.f32 %v3190_v17, %v1027_v25  ;;  %v1480_v30 = vmul.f32 %v3190_v17, %v1155_v26  ;;  %v1029_v31 = vpop.f32.mrb[25].mxu0  ;;  %v1157_v32 = vpop.f32.mrb[25].mxu1 }
 0x1a1   : > { %v2438_v28 = vpack.c.bf16 %v1614_v24, %v1613_v22  ;;  %v1030_v33 = vpop.f32.mrb[26].mxu0  ;;  %v1158_v34 = vpop.f32.mrb[26].mxu1 }
 0x1a2   : > { %2494 = vst [vmem:[%s3208_s22 + $0x28] sm:$0xff] %v2358_v27   ;;  %v1519_v35 = vadd.f32 %v3195_v19, %v1448_v29  ;;  %v1551_v36 = vadd.f32 %v3195_v19, %v1480_v30  ;;  %v1449_v37 = vmul.f32 %v3190_v17, %v1030_v33  ;;  %v1481_v38 = vmul.f32 %v3190_v17, %v1158_v34  ;;  %v1032_v39 = vpop.f32.mrb[27].mxu0  ;;  %v1160_v40 = vpop.f32.mrb[27].mxu1 }
 0x1a3   : > { %2510 = vst [vmem:[%s3208_s22 + $0xa8] sm:$0xff] %v2438_v28  }
 0x1a4   : > { %v1520_v41 = vadd.f32 %v3195_v19, %v1449_v37  ;;  %v1552_v42 = vadd.f32 %v3195_v19, %v1481_v38  ;;  %v1583_v43 = vmax.f32 %v1519_v35, 0.0  ;;  %v1615_v44 = vmax.f32 %v1551_v36, 0.0 }
 0x1a6   : > { %v1584_v45 = vmax.f32 %v1520_v41, 0.0  ;;  %v1616_v46 = vmax.f32 %v1552_v42, 0.0 }
 0x1a7   : > { %v1035_v47 = vpop.f32.mrb[28].mxu0  ;;  %v1163_v48 = vpop.f32.mrb[28].mxu1 }
 0x1a8   : > { %v2363_v49 = vpack.c.bf16 %v1584_v45, %v1583_v43  ;;  %v2443_v50 = vpack.c.bf16 %v1616_v46, %v1615_v44  ;;  %v1450_v51 = vmul.f32 %v3190_v17, %v1035_v47  ;;  %v1482_v52 = vmul.f32 %v3190_v17, %v1163_v48  ;;  %v1037_v53 = vpop.f32.mrb[29].mxu0  ;;  %v1165_v54 = vpop.f32.mrb[29].mxu1 }
 0x1a9   : > { %v1038_v55 = vpop.f32.mrb[30].mxu0  ;;  %v1166_v56 = vpop.f32.mrb[30].mxu1 }
 0x1aa   : > { %2495 = vst [vmem:[%s3208_s22 + $0x30] sm:$0xff] %v2363_v49   ;;  %2511 = vst [vmem:[%s3208_s22 + $0xb0] sm:$0xff] %v2443_v50   ;;  %v1521_v57 = vadd.f32 %v3195_v19, %v1450_v51  ;;  %v1553_v58 = vadd.f32 %v3195_v19, %v1482_v52  ;;  %v1451_v59 = vmul.f32 %v3190_v17, %v1038_v55  ;;  %v1040_v61 = vpop.f32.mrb[31].mxu0  ;;  %v1168_v62 = vpop.f32.mrb[31].mxu1 }
 0x1ab   : > { %v1483_v60 = vmul.f32 %v3190_v17, %v1166_v56 }
 0x1ac   : > { %v1522_v63 = vadd.f32 %v3195_v19, %v1451_v59  ;;  %v1585_v1 = vmax.f32 %v1521_v57, 0.0  ;;  %v1617_v2 = vmax.f32 %v1553_v58, 0.0 }
 0x1ad   : > { %v1554_v0 = vadd.f32 %v3195_v19, %v1483_v60 }
 0x1ae   : > { %v1586_v3 = vmax.f32 %v1522_v63, 0.0 }
 0x1af   : > { %v1618_v4 = vmax.f32 %v1554_v0, 0.0  ;;  %v1043_v5 = vpop.f32.mrb[32].mxu0  ;;  %v1171_v6 = vpop.f32.mrb[32].mxu1 }
 0x1b0   : > { %v2368_v7 = vpack.c.bf16 %v1586_v3, %v1585_v1  ;;  %v1452_v9 = vmul.f32 %v3190_v17, %v1043_v5  ;;  %v1484_v10 = vmul.f32 %v3190_v17, %v1171_v6  ;;  %v1045_v11 = vpop.f32.mrb[33].mxu0  ;;  %v1173_v12 = vpop.f32.mrb[33].mxu1 }
 0x1b1   : > { %v2448_v8 = vpack.c.bf16 %v1618_v4, %v1617_v2  ;;  %v1046_v13 = vpop.f32.mrb[34].mxu0  ;;  %v1174_v14 = vpop.f32.mrb[34].mxu1 }
 0x1b2   : > { %2496 = vst [vmem:[%s3208_s22 + $0x38] sm:$0xff] %v2368_v7   ;;  %v1523_v15 = vadd.f32 %v3195_v19, %v1452_v9  ;;  %v1555_v16 = vadd.f32 %v3195_v19, %v1484_v10  ;;  %v1453_v18 = vmul.f32 %v3190_v17, %v1046_v13  ;;  %v1485_v20 = vmul.f32 %v3190_v17, %v1174_v14  ;;  %v1048_v21 = vpop.f32.mrb[35].mxu0  ;;  %v1176_v22 = vpop.f32.mrb[35].mxu1 }
 0x1b3   : > { %2512 = vst [vmem:[%s3208_s22 + $0xb8] sm:$0xff] %v2448_v8  }
 0x1b4   : > { %v1524_v23 = vadd.f32 %v3195_v19, %v1453_v18  ;;  %v1556_v24 = vadd.f32 %v3195_v19, %v1485_v20  ;;  %v1587_v25 = vmax.f32 %v1523_v15, 0.0  ;;  %v1619_v26 = vmax.f32 %v1555_v16, 0.0 }
 0x1b6   : > { %v1588_v27 = vmax.f32 %v1524_v23, 0.0  ;;  %v1620_v28 = vmax.f32 %v1556_v24, 0.0 }
 0x1b7   : > { %v1051_v29 = vpop.f32.mrb[36].mxu0  ;;  %v1179_v30 = vpop.f32.mrb[36].mxu1 }
 0x1b8   : > { %v2373_v31 = vpack.c.bf16 %v1588_v27, %v1587_v25  ;;  %v2453_v32 = vpack.c.bf16 %v1620_v28, %v1619_v26  ;;  %v1454_v33 = vmul.f32 %v3190_v17, %v1051_v29  ;;  %v1486_v34 = vmul.f32 %v3190_v17, %v1179_v30  ;;  %v1053_v35 = vpop.f32.mrb[37].mxu0  ;;  %v1181_v36 = vpop.f32.mrb[37].mxu1 }
 0x1b9   : > { %v1054_v37 = vpop.f32.mrb[38].mxu0  ;;  %v1182_v38 = vpop.f32.mrb[38].mxu1 }
 0x1ba   : > { %2497 = vst [vmem:[%s3208_s22 + $0x40] sm:$0xff] %v2373_v31   ;;  %2513 = vst [vmem:[%s3208_s22 + $0xc0] sm:$0xff] %v2453_v32   ;;  %v1525_v39 = vadd.f32 %v3195_v19, %v1454_v33  ;;  %v1557_v40 = vadd.f32 %v3195_v19, %v1486_v34  ;;  %v1455_v41 = vmul.f32 %v3190_v17, %v1054_v37  ;;  %v1056_v43 = vpop.f32.mrb[39].mxu0  ;;  %v1184_v44 = vpop.f32.mrb[39].mxu1 }
 0x1bb   : > { %v1487_v42 = vmul.f32 %v3190_v17, %v1182_v38 }
 0x1bc   : > { %v1526_v45 = vadd.f32 %v3195_v19, %v1455_v41  ;;  %v1589_v47 = vmax.f32 %v1525_v39, 0.0  ;;  %v1621_v48 = vmax.f32 %v1557_v40, 0.0 }
 0x1bd   : > { %v1558_v46 = vadd.f32 %v3195_v19, %v1487_v42 }
 0x1be   : > { %v1590_v49 = vmax.f32 %v1526_v45, 0.0 }
 0x1bf   : > { %v1622_v50 = vmax.f32 %v1558_v46, 0.0  ;;  %v1059_v51 = vpop.f32.mrb[40].mxu0  ;;  %v1187_v52 = vpop.f32.mrb[40].mxu1 }
 0x1c0   : > { %v2378_v53 = vpack.c.bf16 %v1590_v49, %v1589_v47  ;;  %v1456_v55 = vmul.f32 %v3190_v17, %v1059_v51  ;;  %v1488_v56 = vmul.f32 %v3190_v17, %v1187_v52  ;;  %v1061_v57 = vpop.f32.mrb[41].mxu0  ;;  %v1189_v58 = vpop.f32.mrb[41].mxu1 }
 0x1c1   : > { %v2458_v54 = vpack.c.bf16 %v1622_v50, %v1621_v48  ;;  %v1062_v59 = vpop.f32.mrb[42].mxu0  ;;  %v1190_v60 = vpop.f32.mrb[42].mxu1 }
 0x1c2   : > { %2498 = vst [vmem:[%s3208_s22 + $0x48] sm:$0xff] %v2378_v53   ;;  %v1527_v61 = vadd.f32 %v3195_v19, %v1456_v55  ;;  %v1559_v62 = vadd.f32 %v3195_v19, %v1488_v56  ;;  %v1457_v63 = vmul.f32 %v3190_v17, %v1062_v59  ;;  %v1489_v0 = vmul.f32 %v3190_v17, %v1190_v60  ;;  %v1064_v1 = vpop.f32.mrb[43].mxu0  ;;  %v1192_v2 = vpop.f32.mrb[43].mxu1 }
 0x1c3   : > { %2514 = vst [vmem:[%s3208_s22 + $0xc8] sm:$0xff] %v2458_v54  }
 0x1c4   : > { %v1528_v3 = vadd.f32 %v3195_v19, %v1457_v63  ;;  %v1560_v4 = vadd.f32 %v3195_v19, %v1489_v0  ;;  %v1591_v5 = vmax.f32 %v1527_v61, 0.0  ;;  %v1623_v6 = vmax.f32 %v1559_v62, 0.0 }
 0x1c6   : > { %v1592_v7 = vmax.f32 %v1528_v3, 0.0  ;;  %v1624_v8 = vmax.f32 %v1560_v4, 0.0 }
 0x1c7   : > { %v1067_v9 = vpop.f32.mrb[44].mxu0  ;;  %v1195_v10 = vpop.f32.mrb[44].mxu1 }
 0x1c8   : > { %v2383_v11 = vpack.c.bf16 %v1592_v7, %v1591_v5  ;;  %v2463_v12 = vpack.c.bf16 %v1624_v8, %v1623_v6  ;;  %v1458_v13 = vmul.f32 %v3190_v17, %v1067_v9  ;;  %v1490_v14 = vmul.f32 %v3190_v17, %v1195_v10  ;;  %v1069_v15 = vpop.f32.mrb[45].mxu0  ;;  %v1197_v16 = vpop.f32.mrb[45].mxu1 }
 0x1c9   : > { %v1070_v18 = vpop.f32.mrb[46].mxu0  ;;  %v1198_v20 = vpop.f32.mrb[46].mxu1 }
 0x1ca   : > { %2499 = vst [vmem:[%s3208_s22 + $0x50] sm:$0xff] %v2383_v11   ;;  %2515 = vst [vmem:[%s3208_s22 + $0xd0] sm:$0xff] %v2463_v12   ;;  %v1529_v21 = vadd.f32 %v3195_v19, %v1458_v13  ;;  %v1561_v22 = vadd.f32 %v3195_v19, %v1490_v14  ;;  %v1459_v23 = vmul.f32 %v3190_v17, %v1070_v18  ;;  %v1072_v25 = vpop.f32.mrb[47].mxu0  ;;  %v1200_v26 = vpop.f32.mrb[47].mxu1 }
 0x1cb   : > { %v1491_v24 = vmul.f32 %v3190_v17, %v1198_v20 }
 0x1cc   : > { %v1530_v27 = vadd.f32 %v3195_v19, %v1459_v23  ;;  %v1593_v29 = vmax.f32 %v1529_v21, 0.0  ;;  %v1625_v30 = vmax.f32 %v1561_v22, 0.0 }
 0x1cd   : > { %v1562_v28 = vadd.f32 %v3195_v19, %v1491_v24 }
 0x1ce   : > { %v1594_v31 = vmax.f32 %v1530_v27, 0.0 }
 0x1cf   : > { %v1626_v32 = vmax.f32 %v1562_v28, 0.0  ;;  %v1075_v33 = vpop.f32.mrb[48].mxu0  ;;  %v1203_v34 = vpop.f32.mrb[48].mxu1 }
 0x1d0   : > { %v2388_v35 = vpack.c.bf16 %v1594_v31, %v1593_v29  ;;  %v1460_v37 = vmul.f32 %v3190_v17, %v1075_v33  ;;  %v1492_v38 = vmul.f32 %v3190_v17, %v1203_v34  ;;  %v1077_v39 = vpop.f32.mrb[49].mxu0  ;;  %v1205_v40 = vpop.f32.mrb[49].mxu1 }
 0x1d1   : > { %v2468_v36 = vpack.c.bf16 %v1626_v32, %v1625_v30  ;;  %v1078_v41 = vpop.f32.mrb[50].mxu0  ;;  %v1206_v42 = vpop.f32.mrb[50].mxu1 }
 0x1d2   : > { %2500 = vst [vmem:[%s3208_s22 + $0x58] sm:$0xff] %v2388_v35   ;;  %v1531_v43 = vadd.f32 %v3195_v19, %v1460_v37  ;;  %v1563_v44 = vadd.f32 %v3195_v19, %v1492_v38  ;;  %v1461_v45 = vmul.f32 %v3190_v17, %v1078_v41  ;;  %v1493_v46 = vmul.f32 %v3190_v17, %v1206_v42  ;;  %v1080_v47 = vpop.f32.mrb[51].mxu0  ;;  %v1208_v48 = vpop.f32.mrb[51].mxu1 }
 0x1d3   : > { %2516 = vst [vmem:[%s3208_s22 + $0xd8] sm:$0xff] %v2468_v36  }
 0x1d4   : > { %v1532_v49 = vadd.f32 %v3195_v19, %v1461_v45  ;;  %v1564_v50 = vadd.f32 %v3195_v19, %v1493_v46  ;;  %v1595_v51 = vmax.f32 %v1531_v43, 0.0  ;;  %v1627_v52 = vmax.f32 %v1563_v44, 0.0 }
 0x1d6   : > { %v1596_v53 = vmax.f32 %v1532_v49, 0.0  ;;  %v1628_v54 = vmax.f32 %v1564_v50, 0.0 }
 0x1d7   : > { %v1083_v55 = vpop.f32.mrb[52].mxu0  ;;  %v1211_v56 = vpop.f32.mrb[52].mxu1 }
 0x1d8   : > { %v2393_v57 = vpack.c.bf16 %v1596_v53, %v1595_v51  ;;  %v2473_v58 = vpack.c.bf16 %v1628_v54, %v1627_v52  ;;  %v1462_v59 = vmul.f32 %v3190_v17, %v1083_v55  ;;  %v1494_v60 = vmul.f32 %v3190_v17, %v1211_v56  ;;  %v1085_v61 = vpop.f32.mrb[53].mxu0  ;;  %v1213_v62 = vpop.f32.mrb[53].mxu1 }
 0x1d9   : > { %v1086_v63 = vpop.f32.mrb[54].mxu0  ;;  %v1214_v0 = vpop.f32.mrb[54].mxu1 }
 0x1da   : > { %2501 = vst [vmem:[%s3208_s22 + $0x60] sm:$0xff] %v2393_v57   ;;  %2517 = vst [vmem:[%s3208_s22 + $0xe0] sm:$0xff] %v2473_v58   ;;  %v1533_v1 = vadd.f32 %v3195_v19, %v1462_v59  ;;  %v1565_v2 = vadd.f32 %v3195_v19, %v1494_v60  ;;  %v1463_v3 = vmul.f32 %v3190_v17, %v1086_v63  ;;  %v1088_v5 = vpop.f32.mrb[55].mxu0  ;;  %v1216_v6 = vpop.f32.mrb[55].mxu1 }
 0x1db   : > { %v1495_v4 = vmul.f32 %v3190_v17, %v1214_v0 }
 0x1dc   : > { %v1534_v7 = vadd.f32 %v3195_v19, %v1463_v3  ;;  %v1597_v9 = vmax.f32 %v1533_v1, 0.0  ;;  %v1629_v10 = vmax.f32 %v1565_v2, 0.0 }
 0x1dd   : > { %v1566_v8 = vadd.f32 %v3195_v19, %v1495_v4 }
 0x1de   : > { %v1598_v11 = vmax.f32 %v1534_v7, 0.0 }
 0x1df   : > { %v1630_v12 = vmax.f32 %v1566_v8, 0.0  ;;  %v1091_v13 = vpop.f32.mrb[56].mxu0  ;;  %v1219_v14 = vpop.f32.mrb[56].mxu1 }
 0x1e0   : > { %v2398_v15 = vpack.c.bf16 %v1598_v11, %v1597_v9  ;;  %v1464_v18 = vmul.f32 %v3190_v17, %v1091_v13  ;;  %v1496_v20 = vmul.f32 %v3190_v17, %v1219_v14  ;;  %v1093_v21 = vpop.f32.mrb[57].mxu0  ;;  %v1221_v22 = vpop.f32.mrb[57].mxu1 }
 0x1e1   : > { %v2478_v16 = vpack.c.bf16 %v1630_v12, %v1629_v10  ;;  %v1094_v23 = vpop.f32.mrb[58].mxu0  ;;  %v1222_v24 = vpop.f32.mrb[58].mxu1 }
 0x1e2   : > { %2502 = vst [vmem:[%s3208_s22 + $0x68] sm:$0xff] %v2398_v15   ;;  %v1535_v25 = vadd.f32 %v3195_v19, %v1464_v18  ;;  %v1567_v26 = vadd.f32 %v3195_v19, %v1496_v20  ;;  %v1465_v27 = vmul.f32 %v3190_v17, %v1094_v23  ;;  %v1497_v28 = vmul.f32 %v3190_v17, %v1222_v24  ;;  %v1096_v29 = vpop.f32.mrb[59].mxu0  ;;  %v1224_v30 = vpop.f32.mrb[59].mxu1 }
 0x1e3   : > { %2518 = vst [vmem:[%s3208_s22 + $0xe8] sm:$0xff] %v2478_v16  }
 0x1e4   : > { %v1536_v31 = vadd.f32 %v3195_v19, %v1465_v27  ;;  %v1568_v32 = vadd.f32 %v3195_v19, %v1497_v28  ;;  %v1599_v33 = vmax.f32 %v1535_v25, 0.0  ;;  %v1631_v34 = vmax.f32 %v1567_v26, 0.0 }
 0x1e6   : > { %v1600_v35 = vmax.f32 %v1536_v31, 0.0  ;;  %v1632_v36 = vmax.f32 %v1568_v32, 0.0 }
 0x1e7   : > { %v1099_v37 = vpop.f32.mrb[60].mxu0  ;;  %v1227_v38 = vpop.f32.mrb[60].mxu1 }
 0x1e8   : > { %v2403_v39 = vpack.c.bf16 %v1600_v35, %v1599_v33  ;;  %v2483_v40 = vpack.c.bf16 %v1632_v36, %v1631_v34  ;;  %v1466_v41 = vmul.f32 %v3190_v17, %v1099_v37  ;;  %v1498_v42 = vmul.f32 %v3190_v17, %v1227_v38  ;;  %v1101_v43 = vpop.f32.mrb[61].mxu0  ;;  %v1229_v44 = vpop.f32.mrb[61].mxu1 }
 0x1e9   : > { %v1102_v45 = vpop.f32.mrb[62].mxu0  ;;  %v1230_v46 = vpop.f32.mrb[62].mxu1 }
 0x1ea   : > { %2503 = vst [vmem:[%s3208_s22 + $0x70] sm:$0xff] %v2403_v39   ;;  %2519 = vst [vmem:[%s3208_s22 + $0xf0] sm:$0xff] %v2483_v40   ;;  %v1537_v47 = vadd.f32 %v3195_v19, %v1466_v41  ;;  %v1569_v48 = vadd.f32 %v3195_v19, %v1498_v42  ;;  %v1467_v49 = vmul.f32 %v3190_v17, %v1102_v45  ;;  %v1104_v51 = vpop.f32.mrb[63].mxu0  ;;  %v1232_v52 = vpop.f32.mrb[63].mxu1 }
 0x1eb   : > { %v1499_v50 = vmul.f32 %v3190_v17, %v1230_v46 }
 0x1ec   : > { %v1538_v53 = vadd.f32 %v3195_v19, %v1467_v49  ;;  %v1601_v55 = vmax.f32 %v1537_v47, 0.0  ;;  %v1633_v56 = vmax.f32 %v1569_v48, 0.0 }
 0x1ed   : > { %v1570_v54 = vadd.f32 %v3195_v19, %v1499_v50 }
 0x1ee   : > { %v1602_v57 = vmax.f32 %v1538_v53, 0.0 }
 0x1ef   : > { %v1634_v58 = vmax.f32 %v1570_v54, 0.0 }
 0x1f0   : > { %v2408_v17 = vpack.c.bf16 %v1602_v57, %v1601_v55 }
 0x1f1   : > { %v2488_v59 = vpack.c.bf16 %v1634_v58, %v1633_v56 }
 0x1f2   : > { %2504 = vst [vmem:[%s3208_s22 + $0x78] sm:$0xff] %v2408_v17  }
 0x1f3   : > { %2520 = vst [vmem:[%s3208_s22 + $0xf8] sm:$0xff] %v2488_v59  }
 0x1f4   : > { %2816 = shalt.err (!%p2813_p5)
}
 0x1f5   : > { %s2817_s23 = scalar_lea.hbm %s3363_s6, 4096  ;;  %s2821_s14 = scalar_lea.hbm %s3419_s4, 16384 }
 0x1f6   : > { %p2818_p9 = scmp.ne.s32.totalorder %s3363_s6, %s2817_s23  ;;  %p2822_p3 = scmp.lt.u32.totalorder %s3363_s6, %s3419_s4 }
 0x1f7   : > { %p2823_p7 = scmp.lt.u32.totalorder %s2821_s14, %s2817_s23  ;;  %p2825_p4 = scmp.lt.u32.totalorder %s2817_s23, %s3363_s6 }
 0x1f8   : > { %p2819_p1 = pnand %p2818_p9, %p3021_p11 }
 0x1f9   : > { %p2824_p13 = por %p2823_p7, %p2822_p3 }
 0x1fa   : > { %p2820_p2 = pneg %p2819_p1 }
 0x1fb   : > { %p2826_p6 = por %p2825_p4, %p2824_p13 }
 0x1fd   : > { %p2827_p8 = pnand %p2826_p6, %p2820_p2 }
 0x1ff   : > { %2830 = shalt.err (!%p2827_p8)
}
 0x200   : > { %s2899_s28 = smov 64   ;;  %s2900_s24 = smov 4  }
 0x201   : > { %2559 = dma.vmem_to_hbm [thread:$0]  (%p3021_p11), %s3365_s13, 4096, %s3363_s6, %s1956_s18, %s2899_s28, %s2899_s28, %s2900_s24  }
 0x202 PF: > { %p2576_p12 = scmp.ge.s32.totalorder %s2889_s20, 2  ;;  %s1985_s30 = sand.u32 1, %s2869_s15  }
 0x203   : > { %p3437_p10 = scmp.ne.s32.totalorder %s3427_s26, 0  ;;  %s1986_s9 = scalar_lea.sflag [#allocation5], %s1985_s30 }
 0x205   : > { %p2570_p0 = pnand %p2576_p12, %p3437_p10 }
 0x207   : > { %2864 = dma.done.wait (!%p2570_p0), %s1986_s9, 4096  }
 0x208   : > { %2866 = vsyncadd (!%p2570_p0), %s1986_s9, 4294963200  ;;  %s21_s20 = sadd.s32 1, %s2889_s20   ;;  %s3438_s15 = smov %s2873_s16 }
 0x209   : > { %p18_p5 = scmp.ge.s32.totalorder %s21_s20, 6   ;;  %s3439_s16 = smov %s2877_s17 }
 0x20a   : > { %s3440_s17 = smov %s3030_s10  ;;  %s3441_s18 = smov %s2885_s19 }
 0x20b   : > { %s3442_s19 = smov %s3444_s5  ;;  %20 = sbr.rel (!%p18_p5) target bundleno = 7 (0x7), region = 100 }
 0x212   :  { %1991 = vsyncpa [#allocation4], 1 }
 0x213   :  { %1993 = vsyncpa [#allocation4 + $0x1], 1 }
 0x214   :  { %1994 = vsyncpa [#allocation7], 1 }
 0x215   :  { %1995 = vsyncpa [#allocation5], 1 }
 0x216   :  { %1997 = vsyncpa [#allocation5 + $0x1], 1 }

</bundles_post_ra>
